<compile_context>
chip_gen: v7x
topology: tpu7x:2x2x1
jax: 0.10.0
libtpu: 0.0.40
codegen_flags: <defaults>
</compile_context>

<pallas_src>
import jax
import jax.numpy as jnp
from jax.experimental import pallas as pl
from jax.experimental.pallas import tpu as pltpu


def _pick_spatial_chunk(hw, c, itemsize=4, max_block_bytes=4 * 1024 * 1024):
    """Largest lane-dense (multiple of 128) divisor of hw such that a
    (1, c, chunk) block stays under max_block_bytes. Falls back to full hw
    if hw is not a multiple of 128 (block == full dim is always legal)."""
    if hw % 128 != 0:
        return hw
    max_chunk = max(128, (max_block_bytes // max(c * itemsize, 1)) // 128 * 128)
    if hw >= 256:
        # Keep at least 2 reduction steps so the software pipeline has overlap.
        max_chunk = min(max_chunk, hw // 2)
    best = 128
    d = 128
    limit = min(hw, max_chunk)
    while d <= limit:
        if hw % d == 0:
            best = d
        d += 128
    return best


def _make_channel_attention_kernel(mid, inv_hw):
    def kernel(x_ref, w1_ref, b1_ref, w2_ref, b2_ref, o_ref, acc_ref):
        # Grid: (batch [parallel], spatial-chunk [arbitrary/reduction]).
        k = pl.program_id(1)

        @pl.when(k == 0)
        def _init():
            acc_ref[...] = jnp.zeros_like(acc_ref)

        # x_ref block: (1, C, chunk) with the lane axis = flattened spatial.
        x = x_ref[0].astype(jnp.float32)                       # (C, chunk)
        acc_ref[...] += jnp.sum(x, axis=-1, keepdims=True)     # (C, 1) partial sum

        @pl.when(k == pl.num_programs(1) - 1)
        def _finalize():
            avg = acc_ref[...] * inv_hw                        # (C, 1) global mean
            w1 = w1_ref[...].astype(jnp.float32)               # (C, mid)
            b1 = b1_ref[...].astype(jnp.float32)               # (1, mid)
            w2 = w2_ref[...].astype(jnp.float32)               # (mid, C)
            b2 = b2_ref[...].astype(jnp.float32)               # (1, C)

            # Linear 1 (VPU mul + sublane reduce; MXU would be <1% utilized).
            h = jnp.sum(avg * w1, axis=0, keepdims=True) + b1  # (1, mid)
            h = jnp.maximum(h, 0.0)                            # ReLU

            # Linear 2: mid = C // reduction is tiny -> unrolled VPU fma.
            out = b2                                           # (1, C)
            for m in range(mid):
                out = out + h[:, m:m + 1] * w2[m:m + 1, :]

            o_ref[...] = out.reshape(o_ref.shape).astype(o_ref.dtype)

    return kernel


def channel_attention(x, w1, b1, w2, b2):
    """x: (B, C, H, W); w1: (C, mid); b1: (mid,); w2: (mid, C); b2: (C,).
    Returns (B, C, H, W): shared_MLP(avg_pool(x)) broadcast over H, W."""
    B, C, H, W = x.shape
    mid = w1.shape[1]
    HW = H * W

    x_flat = x.reshape(B, C, HW)           # free view: lane axis becomes H*W
    chunk = _pick_spatial_chunk(HW, C, itemsize=x.dtype.itemsize)
    num_k = HW // chunk

    b1_2d = b1.reshape(1, mid)
    b2_2d = b2.reshape(1, C)

    kernel = _make_channel_attention_kernel(mid, 1.0 / float(HW))

    pooled = pl.pallas_call(
        kernel,
        out_shape=jax.ShapeDtypeStruct((B, 1, C), jnp.float32),
        grid_spec=pltpu.PrefetchScalarGridSpec(
            num_scalar_prefetch=0,
            grid=(B, num_k),
            in_specs=[
                pl.BlockSpec((1, C, chunk), lambda b, k: (b, 0, k)),
                pl.BlockSpec((C, mid), lambda b, k: (0, 0)),
                pl.BlockSpec((1, mid), lambda b, k: (0, 0)),
                pl.BlockSpec((mid, C), lambda b, k: (0, 0)),
                pl.BlockSpec((1, C), lambda b, k: (0, 0)),
            ],
            out_specs=pl.BlockSpec((1, 1, C), lambda b, k: (b, 0, 0)),
            scratch_shapes=[pltpu.VMEM((C, 1), jnp.float32)],
        ),
        compiler_params=pltpu.CompilerParams(
            dimension_semantics=("parallel", "arbitrary"),
            vmem_limit_bytes=32 * 1024 * 1024,
        ),
    )(x_flat, w1, b1_2d, w2, b2_2d)

    mlp_out = pooled.reshape(B, C).astype(x.dtype)
    # Broadcast outside the kernel: the expanded tensor is 100% redundant data,
    # so writing it from the kernel would double HBM traffic. XLA fuses this
    # broadcast into whatever consumes the result.
    return jnp.broadcast_to(mlp_out[:, :, None, None], (B, C, H, W))


def _reference(x, w1, b1, w2, b2):
    # Pure-JAX reference mirroring the PyTorch forward.
    avg = jnp.mean(x, axis=(2, 3))                       # (B, C)
    h = jnp.maximum(avg @ w1 + b1, 0.0)                  # (B, mid)
    out = h @ w2 + b2                                    # (B, C)
    return jnp.broadcast_to(out[:, :, None, None], x.shape)


if __name__ == "__main__":
    B, C, H, W = 2, 32, 16, 16
    reduction = 16
    mid = C // reduction  # 2

    key = jax.random.PRNGKey(0)
    kx, k1, kb1, k2, kb2 = jax.random.split(key, 5)

    x = jax.random.normal(kx, (B, C, H, W), dtype=jnp.float32)
    # nn.Linear(C, mid): weight (mid, C), bias (mid,). We store w1 = weight.T etc.
    w1 = jax.random.normal(k1, (C, mid), dtype=jnp.float32) * 0.1
    b1 = jax.random.normal(kb1, (mid,), dtype=jnp.float32) * 0.1
    w2 = jax.random.normal(k2, (mid, C), dtype=jnp.float32) * 0.1
    b2 = jax.random.normal(kb2, (C,), dtype=jnp.float32) * 0.1

    out = jax.block_until_ready(channel_attention(x, w1, b1, w2, b2))
    ref = _reference(x, w1, b1, w2, b2)

    assert out.shape == (B, C, H, W)
    assert jnp.allclose(out, ref, atol=1e-5, rtol=1e-5), "mismatch vs reference"

    print("KERNEL_OK")
</pallas_src>

<mosaic_0001>
module attributes {stable_mosaic.version = 11 : i64} {
  func.func @kernel(%arg0: i32, %arg1: i32, %arg2: memref<1x32x128xf32, #tpu.memory_space<vmem>>, %arg3: memref<32x2xf32, #tpu.memory_space<vmem>>, %arg4: memref<1x2xf32, #tpu.memory_space<vmem>>, %arg5: memref<2x32xf32, #tpu.memory_space<vmem>>, %arg6: memref<1x32xf32, #tpu.memory_space<vmem>>, %arg7: memref<1x1x32xf32, #tpu.memory_space<vmem>>, %arg8: memref<32x1xf32, #tpu.memory_space<vmem>>) attributes {dimension_semantics = [#tpu.dimension_semantics<parallel>, #tpu.dimension_semantics<arbitrary>], iteration_bounds = array<i64: 2, 2>, scalar_prefetch = 0 : i64, scratch_operands = 1 : i64, tpu.core_type = #tpu.core_type<tc>, window_params = [{transform_indices = @transform_0, window_bounds = array<i64: 1, 32, 128>}, {pipeline_mode = #tpu.pipeline_mode<synchronous>, transform_indices = @transform_1, window_bounds = array<i64: 32, 2>}, {pipeline_mode = #tpu.pipeline_mode<synchronous>, transform_indices = @transform_2, window_bounds = array<i64: 1, 2>}, {pipeline_mode = #tpu.pipeline_mode<synchronous>, transform_indices = @transform_3, window_bounds = array<i64: 2, 32>}, {pipeline_mode = #tpu.pipeline_mode<synchronous>, transform_indices = @transform_4, window_bounds = array<i64: 1, 32>}, {transform_indices = @transform_5, window_bounds = array<i64: 1, 1, 32>}]} {
    %c0_i32 = arith.constant 0 : i32
    %0 = arith.cmpi eq, %arg1, %c0_i32 : i32
    %1 = arith.extui %0 : i1 to i32
    %c0_i32_0 = arith.constant 0 : i32
    %2 = arith.cmpi ne, %1, %c0_i32_0 : i32
    scf.if %2 {
      %cst_8 = arith.constant 0.000000e+00 : f32
      %13 = vector.broadcast %cst_8 : f32 to vector<32x1xf32>
      %c0_9 = arith.constant 0 : index
      %c0_10 = arith.constant 0 : index
      %14 = vector.load %arg8[%c0_9, %c0_10] : memref<32x1xf32, #tpu.memory_space<vmem>>, vector<32x1xf32>
      tpu.vector_store %arg8[%c0_9, %c0_10], %13 {strides = array<i32>} : memref<32x1xf32, #tpu.memory_space<vmem>>, vector<32x1xf32>,
    } else {
    }
    %c0 = arith.constant 0 : index
    %c0_1 = arith.constant 0 : index
    %c0_2 = arith.constant 0 : index
    %3 = vector.load %arg2[%c0, %c0_1, %c0_2] : memref<1x32x128xf32, #tpu.memory_space<vmem>>, vector<1x32x128xf32>
    %4 = vector.shape_cast %3 : vector<1x32x128xf32> to vector<32x128xf32>
    %c0_3 = arith.constant 0 : index
    %c0_4 = arith.constant 0 : index
    %5 = vector.load %arg8[%c0_3, %c0_4] : memref<32x1xf32, #tpu.memory_space<vmem>>, vector<32x1xf32>
    %cst = arith.constant dense<0.000000e+00> : vector<32xf32>
    %6 = vector.multi_reduction <add>, %4, %cst [1] : vector<32x128xf32> to vector<32xf32>
    %7 = vector.shape_cast %6 : vector<32xf32> to vector<32x1xf32>
    %8 = arith.addf %5, %7 : vector<32x1xf32>
    %c0_5 = arith.constant 0 : index
    %c0_6 = arith.constant 0 : index
    %9 = vector.load %arg8[%c0_5, %c0_6] : memref<32x1xf32, #tpu.memory_space<vmem>>, vector<32x1xf32>
    tpu.vector_store %arg8[%c0_5, %c0_6], %8 {strides = array<i32>} : memref<32x1xf32, #tpu.memory_space<vmem>>, vector<32x1xf32>,
    %c1_i32 = arith.constant 1 : i32
    %10 = arith.cmpi eq, %arg1, %c1_i32 : i32
    %11 = arith.extui %10 : i1 to i32
    %c0_i32_7 = arith.constant 0 : i32
    %12 = arith.cmpi ne, %11, %c0_i32_7 : i32
    scf.if %12 {
      %c0_8 = arith.constant 0 : index
      %c0_9 = arith.constant 0 : index
      %13 = vector.load %arg8[%c0_8, %c0_9] : memref<32x1xf32, #tpu.memory_space<vmem>>, vector<32x1xf32>
      %cst_10 = arith.constant 3.906250e-03 : f32
      %14 = vector.broadcast %cst_10 : f32 to vector<32x1xf32>
      %15 = arith.mulf %13, %14 : vector<32x1xf32>
      %c0_11 = arith.constant 0 : index
      %c0_12 = arith.constant 0 : index
      %16 = vector.load %arg3[%c0_11, %c0_12] : memref<32x2xf32, #tpu.memory_space<vmem>>, vector<32x2xf32>
      %c0_13 = arith.constant 0 : index
      %c0_14 = arith.constant 0 : index
      %17 = vector.load %arg4[%c0_13, %c0_14] : memref<1x2xf32, #tpu.memory_space<vmem>>, vector<1x2xf32>
      %c0_15 = arith.constant 0 : index
      %c0_16 = arith.constant 0 : index
      %18 = vector.load %arg5[%c0_15, %c0_16] : memref<2x32xf32, #tpu.memory_space<vmem>>, vector<2x32xf32>
      %c0_17 = arith.constant 0 : index
      %c0_18 = arith.constant 0 : index
      %19 = vector.load %arg6[%c0_17, %c0_18] : memref<1x32xf32, #tpu.memory_space<vmem>>, vector<1x32xf32>
      %20 = vector.broadcast %15 : vector<32x1xf32> to vector<32x2xf32>
      %21 = arith.mulf %20, %16 : vector<32x2xf32>
      %cst_19 = arith.constant dense<0.000000e+00> : vector<2xf32>
      %22 = vector.multi_reduction <add>, %21, %cst_19 [0] : vector<32x2xf32> to vector<2xf32>
      %23 = vector.shape_cast %22 : vector<2xf32> to vector<1x2xf32>
      %24 = arith.addf %23, %17 : vector<1x2xf32>
      %cst_20 = arith.constant 0.000000e+00 : f32
      %25 = vector.broadcast %cst_20 : f32 to vector<1x2xf32>
      %26 = arith.maximumf %24, %25 : vector<1x2xf32>
      %27 = vector.extract_strided_slice %26 {offsets = [0, 0], sizes = [1, 1], strides = [1, 1]} : vector<1x2xf32> to vector<1x1xf32>
      %28 = vector.extract_strided_slice %18 {offsets = [0, 0], sizes = [1, 32], strides = [1, 1]} : vector<2x32xf32> to vector<1x32xf32>
      %29 = vector.broadcast %27 : vector<1x1xf32> to vector<1x32xf32>
      %30 = arith.mulf %29, %28 : vector<1x32xf32>
      %31 = arith.addf %19, %30 : vector<1x32xf32>
      %32 = vector.extract_strided_slice %26 {offsets = [0, 1], sizes = [1, 1], strides = [1, 1]} : vector<1x2xf32> to vector<1x1xf32>
      %33 = vector.extract_strided_slice %18 {offsets = [1, 0], sizes = [1, 32], strides = [1, 1]} : vector<2x32xf32> to vector<1x32xf32>
      %34 = vector.broadcast %32 : vector<1x1xf32> to vector<1x32xf32>
      %35 = arith.mulf %34, %33 : vector<1x32xf32>
      %36 = arith.addf %31, %35 : vector<1x32xf32>
      %37 = vector.shape_cast %36 : vector<1x32xf32> to vector<1x1x32xf32>
      %c0_21 = arith.constant 0 : index
      %c0_22 = arith.constant 0 : index
      %c0_23 = arith.constant 0 : index
      %38 = vector.load %arg7[%c0_21, %c0_22, %c0_23] : memref<1x1x32xf32, #tpu.memory_space<vmem>>, vector<1x1x32xf32>
      tpu.vector_store %arg7[%c0_21, %c0_22, %c0_23], %37 {strides = array<i32>} : memref<1x1x32xf32, #tpu.memory_space<vmem>>, vector<1x1x32xf32>,
    } else {
    }
    return
  }
  func.func @transform_0(%arg0: i32, %arg1: i32) -> (i32, i32, i32) {
    %c0_i32 = arith.constant 0 : i32
    %c0_i32_0 = arith.constant 0 : i32
    return %arg0, %c0_i32, %arg1 : i32, i32, i32
  }
  func.func @transform_1(%arg0: i32, %arg1: i32) -> (i32, i32) {
    %c0_i32 = arith.constant 0 : i32
    %c0_i32_0 = arith.constant 0 : i32
    %c0_i32_1 = arith.constant 0 : i32
    return %c0_i32, %c0_i32_0 : i32, i32
  }
  func.func @transform_2(%arg0: i32, %arg1: i32) -> (i32, i32) {
    %c0_i32 = arith.constant 0 : i32
    %c0_i32_0 = arith.constant 0 : i32
    %c0_i32_1 = arith.constant 0 : i32
    return %c0_i32, %c0_i32_0 : i32, i32
  }
  func.func @transform_3(%arg0: i32, %arg1: i32) -> (i32, i32) {
    %c0_i32 = arith.constant 0 : i32
    %c0_i32_0 = arith.constant 0 : i32
    %c0_i32_1 = arith.constant 0 : i32
    return %c0_i32, %c0_i32_0 : i32, i32
  }
  func.func @transform_4(%arg0: i32, %arg1: i32) -> (i32, i32) {
    %c0_i32 = arith.constant 0 : i32
    %c0_i32_0 = arith.constant 0 : i32
    %c0_i32_1 = arith.constant 0 : i32
    return %c0_i32, %c0_i32_0 : i32, i32
  }
  func.func @transform_5(%arg0: i32, %arg1: i32) -> (i32, i32, i32) {
    %c0_i32 = arith.constant 0 : i32
    %c0_i32_0 = arith.constant 0 : i32
    %c0_i32_1 = arith.constant 0 : i32
    return %arg0, %c0_i32, %c0_i32_0 : i32, i32, i32
  }
}

</mosaic_0001>

<bundles_post_ra>
// kernel: tpu_custom_call.1
= control target key start
LH: loop header
LB: loop body
LE: loop exit
PB: predicated region body
PF: predicated region fallthrough
CT: control target
= control target key end

     0   :  { %s1020_s0 = inlined_call_operand.hbm [shape: f32[2,32,256], index: 0, kind: input, shape index: {}]   ;;  %s1021_s1 = inlined_call_operand.vmem [shape: f32[32,2], index: 1, kind: input, shape index: {}]   ;;  %s1022_s2 = inlined_call_operand.vmem [shape: f32[1,2], index: 2, kind: input, shape index: {}]   ;;  %s1023_s3 = inlined_call_operand.vmem [shape: f32[2,32], index: 3, kind: input, shape index: {}]   ;;  %s1024_s4 = inlined_call_operand.vmem [shape: f32[1,32], index: 4, kind: input, shape index: {}]   ;;  %s1025_s5 = inlined_call_operand.hbm [shape: f32[2,1,32], index: 5, kind: output, shape index: {}]  }
   0x1   :  { %1030 = sst [smem:[#allocation12_spill]] %s1025_s5 }
   0x2   :  { %10 = vsyncpa [#allocation4], 0 }
   0x3   :  { %12 = vsyncpa [#allocation4 + $0x1], 0 }
   0x4   :  { %13 = vsyncpa [#allocation5], 0 }
   0x5   :  { %15 = vsyncpa [#allocation5 + $0x1], 0  ;;  %s778_s18 = smov 0   ;;  %s780_s19 = smov 0  }
   0x6   :  { %s782_s20 = smov 0   ;;  %s784_s21 = smov 0  }
   0x7   :  { %s786_s22 = smov 0   ;;  %s788_s23 = smov 0  }
   0x8   :  { %s790_s24 = smov 0   ;;  %s792_s25 = smov 0  }
   0x9   :  { %s794_s26 = smov 0   ;;  %s796_s27 = smov 0  }
   0xa   :  { %s798_s28 = smov 0  }
   0xb LB: > { %s460_s29 = sadd.s32 4294967295, %s738_s28   ;;  %s461_s30 = sadd.s32 4294967294, %s738_s28   ;;  %s738_s28 = sphi %s798_s28, %s21_s28   ;;  %s734_s27 = sphi %s796_s27, %s1054_s27   ;;  %s730_s26 = sphi %s794_s26, %s1053_s26   ;;  %s726_s25 = sphi %s792_s25, %s1052_s25   ;;  %s722_s24 = sphi %s790_s24, %s1051_s24   ;;  %s718_s23 = sphi %s788_s23, %s1050_s23   ;;  %s714_s22 = sphi %s786_s22, %s1049_s22   ;;  %s710_s21 = sphi %s784_s21, %s1048_s21   ;;  %s706_s20 = sphi %s782_s20, %s1047_s20   ;;  %s702_s19 = sphi %s780_s19, %s1046_s19   ;;  %s698_s18 = sphi %s778_s18, %s1045_s18  }
   0xc   : > { %s30_s6 = sadd.s32 1, %s730_s26  ;;  %s33_s7 = sadd.s32 1, %s734_s27 }
   0xd   : > { %p31_p0 = scmp.ge.s32.totalorder %s30_s6, 2  ;;  %s42_s8 = sadd.s32 1, %s718_s23 }
   0xe   : > { %p49_p1 = scmp.ne.s32.totalorder %s718_s23, %s714_s22  ;;  %p50_p2 = scmp.eq.s32.totalorder %s738_s28, 0 }
   0xf   : > { %s1056_s6 = smov (%p31_p0, %s30_s6), 0  ;;  %s1058_s7 = smov (!%p31_p0, %s33_s7), %s734_s27 }
  0x10   : > { %1031 = sst [smem:[#allocation9_spill]] %s1056_s6  ;;  %s38_s9 = ssub.s32 %s730_s26, %s1056_s6 }
  0x11   : > { %p844_p3 = por %p50_p2, %p49_p1  ;;  %p35_p4 = scmp.ge.s32.totalorder %s1058_s7, 2 }
  0x12   : > { %p55_p5 = scmp.ne.s32.totalorder %s714_s22, %s710_s21  ;;  %p56_p6 = scmp.eq.s32.totalorder %s460_s29, 0 }
  0x13   : > { %s152_s11 = sadd.s32 1, %s706_s20  ;;  %s1060_s7 = smov (%p35_p4, %s1058_s7), 0 }
  0x14   : > { %1033 = sst [smem:[#allocation10_spill]] %s1060_s7  ;;  %p852_p7 = por %p56_p6, %p55_p5 }
  0x15   : > { %p162_p8 = scmp.ne.s32.totalorder %s706_s20, %s702_s19  ;;  %s37_s13 = ssub.s32 %s734_s27, %s1060_s7 }
  0x16   : > { %p163_p9 = scmp.eq.s32.totalorder %s460_s29, 3  ;;  %s39_s14 = sor.u32 %s38_s9, %s37_s13 }
  0x17   : > { %p150_p10 = scmp.eq.s32.totalorder %s37_s13, 0  ;;  %p40_p11 = scmp.eq.s32.totalorder %s39_s14, 0 }
  0x18   : > { %p860_p12 = por %p163_p9, %p162_p8  ;;  %p168_p13 = scmp.ne.s32.totalorder %s702_s19, %s698_s18 }
  0x19   : > { %s865_s16 = scalar_select %p150_p10, %s706_s20, %s152_s11  }
  0x1a   : > { %s1035_s15 = scalar_select %p860_p12, 1, 0 }
  0x1b   : > { %1036 = sst [smem:[#allocation11_spill]] %s865_s16  ;;  %p169_p0 = scmp.eq.s32.totalorder %s461_s30, 3 }
  0x1c   : > { %s868_s17 = scalar_select %p40_p11, %s718_s23, %s42_s8  }
  0x1d   : > { %p486_p1 = scmp.lt.s32.totalorder %s738_s28, 4  ;;  %p873_p2 = por %p169_p0, %p168_p13 }
  0x1e   : > { %s201_s29 = sand.u32 1, %s718_s23   ;;  %s465_s13 = sshll.u32 %s734_s27, 3 }
  0x1f   : > { %s1037_s21 = scalar_select %p873_p2, 1, 0 }
  0x20   : > { %s464_s9 = sshll.u32 %s201_s29, 5  ;;  %s210_s14 = sadd.s32 %s730_s26, %s465_s13 }
  0x21   : > { %s205_s7 = scalar_lea.vmem [#allocation3], %s464_s9  ;;  %s466_s5 = sshll.u32 %s210_s14, 7 }
  0x22   : > { %s213_s6 = sshll.u32 %s205_s7, 4  ;;  %s885_s8 = scalar_lea.hbm %s1020_s0, %s466_s5  ;;  %s880_s6 = int_to_ptr.vmem [resolvable:$true] %s213_s6 }
  0x23   : > { %p889_p4 = pnand %p486_p1, %p844_p3  ;;  %s893_s7 = scalar_lea.sflag [#allocation4], %s201_s29 }
  0x24   : > { %s586_s9 = scalar_lea.hbm %s885_s8, 512  ;;  %s591_s16 = scalar_lea.hbm %s1020_s0, 2048 }
  0x25   : > { %p587_p5 = scmp.ne.s32.totalorder %s885_s8, %s586_s9  ;;  %p588_p6 = pneg %p889_p4 }
  0x26   : > { %p592_p3 = scmp.lt.u32.totalorder %s885_s8, %s1020_s0  ;;  %p593_p10 = scmp.lt.u32.totalorder %s591_s16, %s586_s9 }
  0x27   : > { %p589_p8 = pnand %p588_p6, %p587_p5  ;;  %p595_p13 = scmp.lt.u32.totalorder %s586_s9, %s885_s8 }
  0x28   : > { %p594_p11 = por %p593_p10, %p592_p3 }
  0x29   : > { %p590_p9 = pneg %p589_p8 }
  0x2a   : > { %p596_p0 = por %p595_p13, %p594_p11 }
  0x2c   : > { %p597_p1 = pnand %p596_p0, %p590_p9 }
  0x2e   : > { %600 = shalt.err (!%p597_p1)
}
  0x2f   : > { %s601_s29 = scalar_lea.vmem %s880_s6, 512  ;;  %s740_s11 = smov [#allocation3]  }
  0x30   : > { %p602_p5 = scmp.ne.s32.totalorder %s880_s6, %s601_s29  ;;  %s606_s5 = sshll.u32 %s740_s11, 4  ;;  %s607_s5 = int_to_ptr.vmem [resolvable:$false] %s606_s5 }
  0x31   : > { %s608_s10 = scalar_lea.vmem %s607_s5, 1024  ;;  %p609_p12 = scmp.lt.s32.totalorder %s880_s6, %s607_s5 }
  0x32   : > { %p604_p8 = pnand %p602_p5, %p588_p6  ;;  %p610_p3 = scmp.lt.s32.totalorder %s608_s10, %s601_s29 }
  0x34   : > { %p605_p2 = pneg %p604_p8  ;;  %p611_p10 = por %p610_p3, %p609_p12 }
  0x36   : > { %p612_p11 = pnand %p611_p10, %p605_p2 }
  0x38   : > { %615 = shalt.err (!%p612_p11)
}
  0x39   : > { %s741_s9 = smov 256   ;;  %s742_s16 = smov 128  }
  0x3a   : > { %s743_s13 = smov 8   ;;  %p467_p6 = scmp.ge.s32.totalorder %s738_s28, 1 }
  0x3b   : > { %481 = dma.hbm_to_vmem [thread:$0]  (!%p889_p4), %s885_s8, 512, %s880_s6, %s893_s7, %s741_s9, %s742_s16, %s743_s13  }
  0x3c   : > { %p221_p9 = scmp.lt.s32.totalorder %s738_s28, 5 }
  0x3e   : > { %p222_p13 = pnand %p467_p6, %p221_p9 }
  0x3f   : > { %s227_s14 = sand.u32 (!%p222_p13), 1, %s714_s22  }
  0x40   : > { %225 = sbr.rel (%p222_p13) target bundleno = 554 (0x22a), region = 40  ;;  %s468_s29 = sshll.u32 (!%p222_p13), %s227_s14, 5 }
  0x41   : > { %s228_s11 = scalar_lea.sflag (!%p222_p13), [#allocation4], %s227_s14  ;;  %s231_s5 = scalar_lea.vmem (!%p222_p13), [#allocation3], %s468_s29 }
  0x47   : > { %689 = dma.done.wait (%p852_p7), %s228_s11, 512  }
  0x48   : > { %691 = vsyncadd (%p852_p7), %s228_s11, 4294966784  ;;  %s255_s10 = sand.u32 1, %s702_s19   ;;  %p469_p12 = scmp.ne.s32.totalorder %s722_s24, 0 }
  0x49   : > { %s931_s6 = scalar_lea.vmem [#allocation6], %s255_s10  ;;  %vm261_vm0 = vcmask (!%p469_p12), 7168   ;;  %v744_v0 = vmov (!%p469_p12), 0.0  }
  0x4a   : > { %260 = sbr.rel (%p469_p12) target bundleno = 81 (0x51), region = 48  ;;  %262 = vst.msk [vmem:[#allocation2] sm:$0xff] (!%p469_p12), %vm261_vm0, %v744_v0  ;;  %263 = vst.msk [vmem:[#allocation2 + $0x8] sm:$0xff] (!%p469_p12), %vm261_vm0, %v744_v0 }
  0x4b   : > { %264 = vst.msk [vmem:[#allocation2 + $0x10] sm:$0xff] (!%p469_p12), %vm261_vm0, %v744_v0  ;;  %265 = vst.msk [vmem:[#allocation2 + $0x18] sm:$0xff] (!%p469_p12), %vm261_vm0, %v744_v0 }
  0x51 PF: > { %v268_v1 = vld [vmem:[%s231_s5 + $0x10] sm:$0xff]  ;;  %v266_v2 = vld [vmem:[%s231_s5] sm:$0xff]  ;;  %v269_v3 = vld [vmem:[%s231_s5 + $0x18] sm:$0xff]  ;;  %vm286_vm1 = vcmask 7168   ;;  %p470_p7 = scmp.ne.s32.totalorder %s722_s24, 1 }
  0x52   : > { %278 = vadd.xlane.f32.xlu1 %v268_v1  ;;  %274 = vadd.xlane.f32.xlu0 %v266_v2  ;;  %v267_v4 = vld [vmem:[%s231_s5 + $0x8] sm:$0xff]  ;;  %v272_v5 = vld [vmem:[#allocation2 + $0x10] sm:$0xff]  ;;  %v270_v6 = vld [vmem:[#allocation2] sm:$0xff]  ;;  %v745_v20 = vmov (!%p470_p7), 0   ;;  %v746_v26 = vmov (!%p470_p7), 1   ;;  %vm334_vm2 = vcmask (!%p470_p7), 15360  }
  0x53   : > { %v273_v11 = vld [vmem:[#allocation2 + $0x18] sm:$0xff]  ;;  %v271_v12 = vld [vmem:[#allocation2 + $0x8] sm:$0xff]  ;;  %583 = vset.pattern.permute.xlu1 (!%p470_p7), %v745_v20  ;;  %582 = vset.pattern.permute.xlu0 (!%p470_p7), %v745_v20  ;;  %v303_v28 = vld [vmem:[%s1021_s1] sm:$0xff] (!%p470_p7)  ;;  %vm366_vm3 = vcmask (!%p470_p7), 253952  }
  0x54   : > { %v305_v30 = vld [vmem:[%s1021_s1 + $0x10] sm:$0xff] (!%p470_p7)  ;;  %v304_v31 = vld [vmem:[%s1021_s1 + $0x8] sm:$0xff] (!%p470_p7)  ;;  %v306_v33 = vld [vmem:[%s1021_s1 + $0x18] sm:$0xff] (!%p470_p7) }
  0x55   : > { %v307_v51 = vld [vmem:[%s1022_s2] sm:$0x1] (!%p470_p7) }
  0x56   : > { %280 = vadd.xlane.f32.xlu1 %v269_v3  ;;  %276 = vadd.xlane.f32.xlu0 %v267_v4  ;;  %v308_v55 = vld [vmem:[%s1023_s3] sm:$0x3] (!%p470_p7) }
  0x57   : > { %v362_v56 = vrot.slane (!%p470_p7), %v308_v55, 1  ;;  %v309_v58 = vld [vmem:[%s1024_s4] sm:$0x1] (!%p470_p7) }
  0xdf   : > { %v279_v7 = vpop.xlane.xlu1 %278  ;;  %v275_v8 = vpop.xlane.xlu0 %274 }
  0xe0   : > { %v284_v9 = vadd.f32 %v279_v7, %v272_v5  ;;  %v282_v10 = vadd.f32 %v275_v8, %v270_v6  ;;  %294 = sbr.rel (%p470_p7) target bundleno = 528 (0x210), region = 52 }
  0xe2   : > { %289 = vst.msk [vmem:[#allocation2 + $0x10] sm:$0xff] %vm286_vm1, %v284_v9  ;;  %287 = vst.msk [vmem:[#allocation2] sm:$0xff] %vm286_vm1, %v282_v10 }
  0xe3   : > { %v281_v13 = vpop.xlane.xlu1 %280  ;;  %v277_v14 = vpop.xlane.xlu0 %276 }
  0xe4   : > { %v285_v15 = vadd.f32 %v281_v13, %v273_v11  ;;  %v283_v16 = vadd.f32 %v277_v14, %v271_v12 }
  0xe6   : > { %290 = vst.msk [vmem:[#allocation2 + $0x18] sm:$0xff] %vm286_vm1, %v285_v15  ;;  %288 = vst.msk [vmem:[#allocation2 + $0x8] sm:$0xff] %vm286_vm1, %v283_v16 }
  0xe9   : > { %v297_v17 = vld [vmem:[#allocation2 + $0x10] sm:$0xff]  ;;  %v295_v18 = vld [vmem:[#allocation2] sm:$0xff] }
  0xea   : > { %v301_v21 = vmul.f32 0.00390625, %v297_v17  ;;  %v299_v22 = vmul.f32 0.00390625, %v295_v18 }
  0xec   : > { %322 = vperm.xlu1 %583, %v301_v21   ;;  %312 = vperm.xlu0 %582, %v299_v22  }
  0xed   : > { %v298_v19 = vld [vmem:[#allocation2 + $0x18] sm:$0xff]  ;;  %v296_v23 = vld [vmem:[#allocation2 + $0x8] sm:$0xff] }
  0xee   : > { %v302_v24 = vmul.f32 0.00390625, %v298_v19  ;;  %v300_v25 = vmul.f32 0.00390625, %v296_v23 }
  0xf0   : > { %327 = vperm.xlu1 %583, %v302_v24   ;;  %317 = vperm.xlu0 %582, %v300_v25  }
  0xf4   : > { %584 = vset.pattern.permute.xlu1 %v746_v26 }
 0x16b   : > { %v323_v27 = vpop.permute.xlu1 %322  ;;  %v313_v29 = vpop.permute.xlu0 %312 }
 0x16c   : > { %v330_v32 = vmul.f32 %v313_v29, %v303_v28  ;;  %v332_v36 = vmul.f32 %v323_v27, %v305_v30 }
 0x16e   : > { %v335_v38 = vsel %vm334_vm2, %v330_v32, 0.0  ;;  %v338_v42 = vsel %vm334_vm2, %v332_v36, 0.0 }
 0x16f   : > { %v328_v34 = vpop.permute.xlu1 %327  ;;  %v318_v35 = vpop.permute.xlu0 %317 }
 0x170   : > { %v331_v37 = vmul.f32 %v318_v35, %v304_v31  ;;  %v333_v39 = vmul.f32 %v328_v34, %v306_v33 }
 0x172   : > { %v336_v40 = vsel %vm334_vm2, %v331_v37, 0.0  ;;  %v340_v44 = vsel %vm334_vm2, %v333_v39, 0.0 }
 0x173   : > { %v337_v41 = vadd.f32 %v336_v40, %v335_v38 }
 0x175   : > { %v339_v43 = vadd.f32 %v338_v42, %v337_v41 }
 0x177   : > { %v341_v45 = vadd.f32 %v340_v44, %v339_v43 }
 0x179   : > { %v342_v46 = vrot.slane %v341_v45, 4 }
 0x17b   : > { %v343_v47 = vadd.f32 %v342_v46, %v341_v45 }
 0x17d   : > { %v344_v48 = vrot.slane %v343_v47, 2 }
 0x17f   : > { %v345_v49 = vadd.f32 %v344_v48, %v343_v47 }
 0x181   : > { %v346_v50 = vrot.slane %v345_v49, 1 }
 0x183   : > { %v347_v52 = vadd.f32 %v346_v50, %v345_v49 }
 0x185   : > { %v348_v53 = vadd.f32 %v347_v52, %v307_v51 }
 0x187   : > { %v349_v54 = vmax.f32 %v348_v53, 0.0 }
 0x189   : > { %358 = vperm.xlu1 %584, %v349_v54   ;;  %352 = vperm.xlu0 %582, %v349_v54  }
 0x18d   : > { %585 = vset.pattern.permute.xlu0 %v746_v26 }
 0x208   : > { %v359_v57 = vpop.permute.xlu1 %358  ;;  %v353_v59 = vpop.permute.xlu0 %352 }
 0x209   : > { %v355_v60 = vmul.f32 %v353_v59, %v308_v55  ;;  %v364_v61 = vmul.f32 %v362_v56, %v359_v57 }
 0x20b   : > { %v356_v62 = vadd.f32 %v355_v60, %v309_v58 }
 0x20d   : > { %v365_v63 = vadd.f32 %v364_v61, %v356_v62 }
 0x20f   : > { %367 = vst.msk [vmem:[%s931_s6] sm:$0x1] %vm366_vm3, %v365_v63 }
 0x210 PF: > { %s471_s8 = sshll.u32 %s726_s25, 4  ;;  %s1039_s9 = sld [smem:[#allocation12_spill]] }
 0x211   : > { %s381_s13 = sshll.u32 %s931_s6, 4  ;;  %s369_s14 = scalar_lea.sflag [#allocation5], %s255_s10  ;;  %s382_s13 = int_to_ptr.vmem [resolvable:$true] %s381_s13 }
 0x212   : > { %s616_s29 = scalar_lea.vmem %s382_s13, 16  ;;  %p1040_p4 = scmp.ne.s32.totalorder %s1035_s15, 0 }
 0x213   : > { %p617_p2 = scmp.ne.s32.totalorder %s382_s13, %s616_s29  ;;  %s747_s11 = smov [#allocation6]  }
 0x214   : > { %s620_s5 = sshll.u32 %s747_s11, 4  ;;  %s621_s5 = int_to_ptr.vmem [resolvable:$false] %s620_s5 }
 0x215   : > { %p618_p0 = pnand %p617_p2, %p1040_p4  ;;  %s622_s24 = scalar_lea.vmem %s621_s5, 32 }
 0x216   : > { %s961_s16 = scalar_lea.hbm %s1039_s9, %s471_s8  ;;  %p623_p5 = scmp.lt.s32.totalorder %s382_s13, %s621_s5 }
 0x217   : > { %p619_p1 = pneg %p618_p0  ;;  %p624_p8 = scmp.lt.s32.totalorder %s622_s24, %s616_s29 }
 0x219   : > { %p625_p3 = por %p624_p8, %p623_p5 }
 0x21b   : > { %p626_p10 = pnand %p625_p3, %p619_p1 }
 0x21d   : > { %629 = shalt.err (!%p626_p10)
}
 0x21e   : > { %s630_s25 = scalar_lea.hbm %s961_s16, 16  ;;  %s634_s12 = scalar_lea.hbm %s1039_s9, 32 }
 0x21f   : > { %p631_p11 = scmp.ne.s32.totalorder %s961_s16, %s630_s25  ;;  %p635_p13 = scmp.lt.u32.totalorder %s961_s16, %s1039_s9 }
 0x220   : > { %p636_p12 = scmp.lt.u32.totalorder %s634_s12, %s630_s25  ;;  %p638_p2 = scmp.lt.u32.totalorder %s630_s25, %s961_s16 }
 0x221   : > { %p632_p6 = pnand %p631_p11, %p1040_p4 }
 0x222   : > { %p637_p7 = por %p636_p12, %p635_p13 }
 0x223   : > { %p633_p9 = pneg %p632_p6 }
 0x224   : > { %p639_p0 = por %p638_p2, %p637_p7 }
 0x226   : > { %p640_p1 = pnand %p639_p0, %p633_p9 }
 0x228   : > { %643 = shalt.err (!%p640_p1)
}
 0x229   : > { %476 = dma.vmem_to_hbm [thread:$0]  (%p1040_p4), %s382_s13, 16, %s961_s16, %s369_s14  }
 0x22a PF: > { %p487_p5 = scmp.ge.s32.totalorder %s738_s28, 2  ;;  %s393_s7 = sand.u32 1, %s698_s18  }
 0x22b   : > { %p1041_p8 = scmp.ne.s32.totalorder %s1037_s21, 0  ;;  %s394_s29 = scalar_lea.sflag [#allocation5], %s393_s7 }
 0x22d   : > { %p483_p3 = pnand %p487_p5, %p1041_p8 }
 0x22f   : > { %693 = dma.done.wait (!%p483_p3), %s394_s29, 16  }
 0x230   : > { %695 = vsyncadd (!%p483_p3), %s394_s29, 4294967280  ;;  %s21_s28 = sadd.s32 1, %s738_s28   ;;  %s1042_s11 = sld [smem:[#allocation11_spill]] }
 0x231   : > { %p18_p10 = scmp.ge.s32.totalorder %s21_s28, 6   ;;  %s1043_s15 = sld [smem:[#allocation9_spill]] }
 0x232   : > { %s1044_s16 = sld [smem:[#allocation10_spill]]  ;;  %s1045_s18 = smov %s702_s19 }
 0x233   : > { %s1046_s19 = smov %s706_s20  ;;  %s1048_s21 = smov %s714_s22 }
 0x234   : > { %s1049_s22 = smov %s718_s23  ;;  %s1050_s23 = smov %s868_s17 }
 0x235   : > { %s1051_s24 = smov %s730_s26  ;;  %s1052_s25 = smov %s734_s27 }
 0x236   : > { %s1047_s20 = smov %s1042_s11  ;;  %20 = sbr.rel (!%p18_p10) target bundleno = 11 (0xb), region = 93 }
 0x237   : > { %s1053_s26 = smov %s1043_s15 }
 0x238   : > { %s1054_s27 = smov %s1044_s16 }
 0x23d   :  { %398 = vsyncpa [#allocation4], 1 }
 0x23e   :  { %400 = vsyncpa [#allocation4 + $0x1], 1 }
 0x23f   :  { %401 = vsyncpa [#allocation5], 1 }
 0x240   :  { %403 = vsyncpa [#allocation5 + $0x1], 1 }

</bundles_post_ra>
